<compile_context>
chip_gen: v7x
topology: tpu7x:2x2x1
jax: 0.10.0
libtpu: 0.0.40
codegen_flags: <defaults>
</compile_context>

<pallas_src>
import math

import jax
import jax.numpy as jnp
from jax.experimental import pallas as pl
from jax.experimental.pallas import tpu as pltpu


def _round_up(v, m):
    return ((v + m - 1) // m) * m


def _linear_kernel(x_ref, w_ref, b_ref, o_ref):
    """x_ref: (TM, Dp) row tile; w_ref: (Dp, Hp) resident; b_ref: (1, Hp);
    o_ref: (TM, Hp).  Plain MXU matmul + broadcast bias add."""
    acc = jnp.dot(x_ref[...], w_ref[...], preferred_element_type=jnp.float32)
    o_ref[...] = (acc + b_ref[...]).astype(o_ref.dtype)


def janossy_pool(x, w, bias, perm, *, max_tile_m=512):
    """x: (N, D) f32, w: (D, H) f32, bias: (H,) f32, perm: (N,) int32.

    Returns module(x[perm]) with module = Linear(D, H).
    Implemented as (x @ W + b)[perm]  (exact for a row-wise Linear)."""
    n, d = x.shape
    d2, h = w.shape
    assert d == d2, "weight shape mismatch"

    # Lane-dense padding for the feature dims; sublane/tile padding for rows.
    d_pad = _round_up(d, 128)
    h_pad = _round_up(h, 128)
    if n <= max_tile_m:
        tm = _round_up(n, 8)          # one grid step for small problems
        n_pad = tm
    else:
        tm = max_tile_m
        n_pad = _round_up(n, tm)

    x_p = jnp.zeros((n_pad, d_pad), x.dtype).at[:n, :d].set(x)
    w_p = jnp.zeros((d_pad, h_pad), w.dtype).at[:d, :h].set(w)
    b_p = jnp.zeros((1, h_pad), bias.dtype).at[0, :h].set(bias)

    y = pl.pallas_call(
        _linear_kernel,
        out_shape=jax.ShapeDtypeStruct((n_pad, h_pad), x.dtype),
        grid_spec=pltpu.PrefetchScalarGridSpec(
            num_scalar_prefetch=0,
            grid=(n_pad // tm,),
            in_specs=[
                pl.BlockSpec((tm, d_pad), lambda i: (i, 0)),    # x row tile
                pl.BlockSpec((d_pad, h_pad), lambda i: (0, 0)),  # W (resident)
                pl.BlockSpec((1, h_pad), lambda i: (0, 0)),      # bias (resident)
            ],
            out_specs=pl.BlockSpec((tm, h_pad), lambda i: (i, 0)),
        ),
        compiler_params=pltpu.CompilerParams(
            dimension_semantics=("parallel",),   # shard row tiles across TCs on v7x
        ),
    )(x_p, w_p, b_p)

    # Strip padding, then apply the row permutation (commuted past the Linear).
    y = y[:n, :h]
    return jnp.take(y, perm, axis=0)


if __name__ == "__main__":
    # Small, non-aligned shapes to exercise the padding path.
    N, D, H = 64, 48, 32

    key = jax.random.PRNGKey(0)
    kx, kw, kb, kp = jax.random.split(key, 4)

    # Deterministic synthetic parameters (Linear(D, H) init-like scaling).
    x = jax.random.normal(kx, (N, D), dtype=jnp.float32)
    w = jax.random.normal(kw, (D, H), dtype=jnp.float32) * (1.0 / math.sqrt(D))
    bias = jax.random.normal(kb, (H,), dtype=jnp.float32) * 0.01

    # Deterministic stand-in for np.random.shuffle(indices).
    perm = jax.random.permutation(kp, N).astype(jnp.int32)

    out = jax.block_until_ready(janossy_pool(x, w, bias, perm))

    # Pure-JAX reference: module(x[indices]) with module = Linear.
    ref = x[perm] @ w + bias
    assert out.shape == ref.shape, "shape mismatch vs reference"
    assert jnp.allclose(out, ref, atol=1e-3, rtol=1e-3), "mismatch vs reference"

    print("KERNEL_OK")
</pallas_src>

<mosaic_0001>
module attributes {stable_mosaic.version = 11 : i64} {
  func.func @_linear_kernel(%arg0: i32, %arg1: memref<64x128xf32, #tpu.memory_space<vmem>>, %arg2: memref<128x128xf32, #tpu.memory_space<vmem>>, %arg3: memref<1x128xf32, #tpu.memory_space<vmem>>, %arg4: memref<64x128xf32, #tpu.memory_space<vmem>>) attributes {dimension_semantics = [#tpu.dimension_semantics<parallel>], iteration_bounds = array<i64: 1>, scalar_prefetch = 0 : i64, scratch_operands = 0 : i64, tpu.core_type = #tpu.core_type<tc>, window_params = [{transform_indices = @transform_0, window_bounds = array<i64: 64, 128>}, {pipeline_mode = #tpu.pipeline_mode<synchronous>, transform_indices = @transform_1, window_bounds = array<i64: 128, 128>}, {pipeline_mode = #tpu.pipeline_mode<synchronous>, transform_indices = @transform_2, window_bounds = array<i64: 1, 128>}, {transform_indices = @transform_3, window_bounds = array<i64: 64, 128>}]} {
    %c0 = arith.constant 0 : index
    %c0_0 = arith.constant 0 : index
    %0 = vector.load %arg1[%c0, %c0_0] : memref<64x128xf32, #tpu.memory_space<vmem>>, vector<64x128xf32>
    %c0_1 = arith.constant 0 : index
    %c0_2 = arith.constant 0 : index
    %1 = vector.load %arg2[%c0_1, %c0_2] : memref<128x128xf32, #tpu.memory_space<vmem>>, vector<128x128xf32>
    %cst = arith.constant dense<0.000000e+00> : vector<64x128xf32>
    %2 = tpu.matmul %0, %1, %cst {dimension_numbers = #tpu.dot_dimension_numbers<[1], [0], [0], [1], [0, 0, 1, 1], [], []>} : vector<64x128xf32>, vector<128x128xf32>, vector<64x128xf32> -> vector<64x128xf32>
    %c0_3 = arith.constant 0 : index
    %c0_4 = arith.constant 0 : index
    %3 = vector.load %arg3[%c0_3, %c0_4] : memref<1x128xf32, #tpu.memory_space<vmem>>, vector<1x128xf32>
    %4 = vector.broadcast %3 : vector<1x128xf32> to vector<64x128xf32>
    %5 = arith.addf %2, %4 : vector<64x128xf32>
    %c0_5 = arith.constant 0 : index
    %c0_6 = arith.constant 0 : index
    %6 = vector.load %arg4[%c0_5, %c0_6] : memref<64x128xf32, #tpu.memory_space<vmem>>, vector<64x128xf32>
    tpu.vector_store %arg4[%c0_5, %c0_6], %5 {strides = array<i32>} : memref<64x128xf32, #tpu.memory_space<vmem>>, vector<64x128xf32>,
    return
  }
  func.func @transform_0(%arg0: i32) -> (i32, i32) {
    %c0_i32 = arith.constant 0 : i32
    %c0_i32_0 = arith.constant 0 : i32
    return %arg0, %c0_i32 : i32, i32
  }
  func.func @transform_1(%arg0: i32) -> (i32, i32) {
    %c0_i32 = arith.constant 0 : i32
    %c0_i32_0 = arith.constant 0 : i32
    %c0_i32_1 = arith.constant 0 : i32
    return %c0_i32, %c0_i32_0 : i32, i32
  }
  func.func @transform_2(%arg0: i32) -> (i32, i32) {
    %c0_i32 = arith.constant 0 : i32
    %c0_i32_0 = arith.constant 0 : i32
    %c0_i32_1 = arith.constant 0 : i32
    return %c0_i32, %c0_i32_0 : i32, i32
  }
  func.func @transform_3(%arg0: i32) -> (i32, i32) {
    %c0_i32 = arith.constant 0 : i32
    %c0_i32_0 = arith.constant 0 : i32
    return %arg0, %c0_i32 : i32, i32
  }
}

</mosaic_0001>

<bundles_post_ra>
// kernel: tpu_custom_call.1
= control target key start
LH: loop header
LB: loop body
LE: loop exit
PB: predicated region body
PF: predicated region fallthrough
CT: control target
= control target key end

     0   :  { %8 = vsyncpa [#allocation3], 0  ;;  %s472_s0 = inlined_call_operand.hbm [shape: f32[64,128], index: 0, kind: input, shape index: {}]   ;;  %s473_s1 = inlined_call_operand.hbm [shape: f32[128,128], index: 1, kind: input, shape index: {}]   ;;  %s474_s2 = inlined_call_operand.vmem [shape: f32[1,128], index: 2, kind: input, shape index: {}]   ;;  %s475_s3 = inlined_call_operand.hbm [shape: f32[64,128], index: 3, kind: output, shape index: {}]  }
   0x1   :  { %9 = vsyncpa [#allocation6], 0 }
   0x2   :  { %10 = vsyncpa [#allocation4], 0  ;;  %s399_s12 = smov [#allocation2]   ;;  %s327_s16 = scalar_lea.hbm %s472_s0, 1024 }
   0x3   :  { %s16_s13 = sshll.u32 %s399_s12, 4  ;;  %p328_p0 = scmp.ne.s32.totalorder %s472_s0, %s327_s16  ;;  %s17_s13 = int_to_ptr.vmem [resolvable:$true] %s16_s13 }
   0x4   :  { %p331_p1 = scmp.lt.u32.totalorder %s327_s16, %s472_s0 }
   0x6   :  { %p333_p2 = pnand %p331_p1, %p328_p0 }
   0x8   :  { %336 = shalt.err (!%p333_p2)
}
   0x9   :  { %s337_s21 = scalar_lea.vmem %s17_s13, 1024  ;;  %p342_p4 = scmp.lt.s32.totalorder %s17_s13, %s17_s13 }
   0xa   :  { %p338_p3 = scmp.ne.s32.totalorder %s17_s13, %s337_s21  ;;  %p343_p5 = scmp.lt.s32.totalorder %s337_s21, %s337_s21 }
   0xc   :  { %p344_p6 = por %p343_p5, %p342_p4 }
   0xe   :  { %p345_p7 = pnand %p344_p6, %p338_p3 }
  0x10   :  { %348 = shalt.err (!%p345_p7)
}
  0x11   :  { %s400_s22 = smov 128   ;;  %s401_s23 = smov 8  }
  0x12   :  { %22 = dma.hbm_to_vmem [thread:$0]  %s472_s0, 1024, %s17_s13, [#allocation3], %s400_s22, %s400_s22, %s401_s23  }
  0x13   :  { %s402_s26 = smov [#allocation5]   ;;  %s349_s30 = scalar_lea.hbm %s473_s1, 2048 }
  0x14   :  { %s28_s27 = sshll.u32 %s402_s26, 4  ;;  %p350_p8 = scmp.ne.s32.totalorder %s473_s1, %s349_s30  ;;  %s29_s27 = int_to_ptr.vmem [resolvable:$true] %s28_s27 }
  0x15   :  { %p353_p9 = scmp.lt.u32.totalorder %s349_s30, %s473_s1 }
  0x17   :  { %p355_p10 = pnand %p353_p9, %p350_p8 }
  0x19   :  { %358 = shalt.err (!%p355_p10)
}
  0x1a   :  { %s359_s8 = scalar_lea.vmem %s29_s27, 2048  ;;  %p364_p12 = scmp.lt.s32.totalorder %s29_s27, %s29_s27 }
  0x1b   :  { %p360_p11 = scmp.ne.s32.totalorder %s29_s27, %s359_s8  ;;  %p365_p13 = scmp.lt.s32.totalorder %s359_s8, %s359_s8 }
  0x1d   :  { %p366_p0 = por %p365_p13, %p364_p12 }
  0x1f   :  { %p367_p1 = pnand %p366_p0, %p360_p11 }
  0x21   :  { %370 = shalt.err (!%p367_p1)
}
  0x22   :  { %34 = dma.hbm_to_vmem [thread:$0]  %s473_s1, 2048, %s29_s27, [#allocation6], %s400_s22, %s400_s22, %s401_s23  }
  0x23   :  { %393 = dma.done.wait [#allocation3], 1024  }
  0x24   :  { %394 = vsyncadd [#allocation3], 4294966272 }
  0x25   :  { %395 = dma.done.wait [#allocation6], 2048  }
  0x26   :  { %396 = vsyncadd [#allocation6], 4294965248  ;;  %v51_v0 = vld [vmem:[#allocation5] sm:$0xff]  ;;  %v52_v1 = vld [vmem:[#allocation5 + $0x8] sm:$0xff]  ;;  %s403_s11 = smov [#allocation7]  }
  0x27   :  { %v53_v2 = vld [vmem:[#allocation5 + $0x10] sm:$0xff]  ;;  %v274_v3 = vpack.c.bf16 %v52_v1, %v51_v0  ;;  %v54_v4 = vld [vmem:[#allocation5 + $0x18] sm:$0xff]  ;;  %v55_v6 = vld [vmem:[#allocation5 + $0x20] sm:$0xff]  ;;  %s192_s12 = sshll.u32 %s403_s11, 4  ;;  %s193_s12 = int_to_ptr.vmem [resolvable:$true] %s192_s12 }
  0x28   :  { %v278_v5 = vpack.c.bf16 %v54_v4, %v53_v2  ;;  %v56_v7 = vld [vmem:[#allocation5 + $0x28] sm:$0xff]  ;;  %v43_v9 = vld [vmem:[#allocation2] sm:$0xff]  ;;  %v57_v11 = vld [vmem:[#allocation5 + $0x30] sm:$0xff]  ;;  %p376_p3 = scmp.lt.s32.totalorder %s193_s12, %s193_s12 }
  0x29   :  { %275 = vmatprep.subr.bf16.mxu0 %v274_v3  ;;  %306 = vmatprep.subr.bf16.mxu1 %v274_v3  ;;  %v282_v8 = vpack.c.bf16 %v56_v7, %v55_v6  ;;  %v47_v10 = vld [vmem:[#allocation2 + $0x20] sm:$0xff]  ;;  %v58_v12 = vld [vmem:[#allocation5 + $0x38] sm:$0xff]  ;;  %v60_v15 = vld [vmem:[#allocation5 + $0x48] sm:$0xff] }
  0x2a   :  { %277 = vmatpush3.bf16.msra.mxu0 %v274_v3  ;;  %314 = vmatpush3.bf16.msra.mxu1 %v274_v3  ;;  %v286_v13 = vpack.c.bf16 %v58_v12, %v57_v11  ;;  %v59_v14 = vld [vmem:[#allocation5 + $0x40] sm:$0xff]  ;;  %v61_v17 = vld [vmem:[#allocation5 + $0x50] sm:$0xff]  ;;  %v62_v18 = vld [vmem:[#allocation5 + $0x58] sm:$0xff] }
  0x2b   :  { %279 = vmatprep.subr.bf16.mxu0 %v278_v5  ;;  %307 = vmatprep.subr.bf16.mxu1 %v278_v5  ;;  %v290_v16 = vpack.c.bf16 %v60_v15, %v59_v14  ;;  %v294_v19 = vpack.c.bf16 %v62_v18, %v61_v17  ;;  %v63_v20 = vld [vmem:[#allocation5 + $0x60] sm:$0xff]  ;;  %v64_v21 = vld [vmem:[#allocation5 + $0x68] sm:$0xff]  ;;  %v65_v23 = vld [vmem:[#allocation5 + $0x70] sm:$0xff] }
  0x2c   :  { %262 = vmatprep.mubr.f32.mxu0 %v43_v9  ;;  %268 = vmatprep.mubr.f32.mxu1 %v47_v10  ;;  %v298_v22 = vpack.c.bf16 %v64_v21, %v63_v20  ;;  %v66_v24 = vld [vmem:[#allocation5 + $0x78] sm:$0xff]  ;;  %v44_v26 = vld [vmem:[#allocation2 + $0x8] sm:$0xff]  ;;  %v45_v28 = vld [vmem:[#allocation2 + $0x10] sm:$0xff] }
  0x2d   :  { %v302_v25 = vpack.c.bf16 %v66_v24, %v65_v23  ;;  %v48_v27 = vld [vmem:[#allocation2 + $0x28] sm:$0xff]  ;;  %v49_v29 = vld [vmem:[#allocation2 + $0x30] sm:$0xff]  ;;  %v46_v30 = vld [vmem:[#allocation2 + $0x18] sm:$0xff] }
  0x2e   :  { %281 = vmatpush3.bf16.msra.mxu0 %v278_v5  ;;  %315 = vmatpush3.bf16.msra.mxu1 %v278_v5  ;;  %v50_v31 = vld [vmem:[#allocation2 + $0x38] sm:$0xff]  ;;  %v205_v32 = vld [vmem:[%s474_s2] ss:$0 sm:$0xff]  ;;  %s371_s2 = scalar_lea.vmem %s193_s12, 1024 }
  0x2f   :  { %283 = vmatprep.subr.bf16.mxu0 %v282_v8  ;;  %308 = vmatprep.subr.bf16.mxu1 %v282_v8  ;;  %p372_p2 = scmp.ne.s32.totalorder %s193_s12, %s371_s2  ;;  %p377_p4 = scmp.lt.s32.totalorder %s371_s2, %s371_s2 }
  0x31   :  { %p378_p5 = por %p377_p4, %p376_p3 }
  0x32   :  { %285 = vmatpush3.bf16.msra.mxu0 %v282_v8  ;;  %316 = vmatpush3.bf16.msra.mxu1 %v282_v8 }
  0x33   :  { %287 = vmatprep.subr.bf16.mxu0 %v286_v13  ;;  %309 = vmatprep.subr.bf16.mxu1 %v286_v13  ;;  %p379_p6 = pnand %p378_p5, %p372_p2 }
  0x36   :  { %289 = vmatpush3.bf16.msra.mxu0 %v286_v13  ;;  %317 = vmatpush3.bf16.msra.mxu1 %v286_v13 }
  0x37   :  { %291 = vmatprep.subr.bf16.mxu0 %v290_v16  ;;  %310 = vmatprep.subr.bf16.mxu1 %v290_v16 }
  0x3a   :  { %293 = vmatpush3.bf16.msra.mxu0 %v290_v16  ;;  %318 = vmatpush3.bf16.msra.mxu1 %v290_v16 }
  0x3b   :  { %295 = vmatprep.subr.bf16.mxu0 %v294_v19  ;;  %311 = vmatprep.subr.bf16.mxu1 %v294_v19 }
  0x3e   :  { %297 = vmatpush3.bf16.msra.mxu0 %v294_v19  ;;  %319 = vmatpush3.bf16.msra.mxu1 %v294_v19 }
  0x3f   :  { %299 = vmatprep.subr.bf16.mxu0 %v298_v22  ;;  %312 = vmatprep.subr.bf16.mxu1 %v298_v22 }
  0x42   :  { %301 = vmatpush3.bf16.msra.mxu0 %v298_v22  ;;  %320 = vmatpush3.bf16.msra.mxu1 %v298_v22 }
  0x43   :  { %303 = vmatprep.subr.bf16.mxu0 %v302_v25  ;;  %313 = vmatprep.subr.bf16.mxu1 %v302_v25 }
  0x46   :  { %305 = vmatpush3.bf16.msra.mxu0 %v302_v25  ;;  %321 = vmatpush3.bf16.msra.mxu1 %v302_v25 }
  0x49   :  { %263 = vmatmul.mubr.f32.vlgmr.msra.gmra.mrb[0].mxu0 %v44_v26  ;;  %269 = vmatmul.mubr.f32.vlgmr.msra.gmra.mrb[0].mxu1 %v48_v27 }
  0x4a   :  { %265 = vmatprep.mubr.f32.mxu0 %v45_v28  ;;  %271 = vmatprep.mubr.f32.mxu1 %v49_v29 }
  0x4d   :  { %266 = vmatmul.mubr.f32.gmra.mrb[2].mxu0 %v46_v30  ;;  %272 = vmatmul.mubr.f32.gmra.mrb[2].mxu1 %v50_v31 }
 0x11c   :  { %v264_v33 = vpop.f32.mrb[0].mxu0  ;;  %v270_v34 = vpop.f32.mrb[0].mxu1 }
 0x11d   :  { %v146_v35 = vadd.f32 %v264_v33, %v205_v32  ;;  %v166_v36 = vadd.f32 %v270_v34, %v205_v32  ;;  %v140_v37 = vpop.f32.mrb[1].mxu0  ;;  %v160_v38 = vpop.f32.mrb[1].mxu1 }
 0x11e   :  { %v141_v39 = vadd.f32 %v205_v32, %v140_v37  ;;  %v161_v40 = vadd.f32 %v205_v32, %v160_v38 }
 0x11f   :  { %180 = vst [vmem:[#allocation7 + $0x8] sm:$0xff] %v146_v35  ;;  %184 = vst [vmem:[#allocation7 + $0x28] sm:$0xff] %v166_v36 }
 0x120   :  { %179 = vst [vmem:[#allocation7] sm:$0xff] %v141_v39  ;;  %183 = vst [vmem:[#allocation7 + $0x20] sm:$0xff] %v161_v40  ;;  %v267_v41 = vpop.f32.mrb[2].mxu0  ;;  %v273_v42 = vpop.f32.mrb[2].mxu1 }
 0x121   :  { %v156_v43 = vadd.f32 %v267_v41, %v205_v32  ;;  %v176_v44 = vadd.f32 %v273_v42, %v205_v32  ;;  %v150_v45 = vpop.f32.mrb[3].mxu0  ;;  %v170_v46 = vpop.f32.mrb[3].mxu1 }
 0x122   :  { %v151_v47 = vadd.f32 %v205_v32, %v150_v45  ;;  %v171_v48 = vadd.f32 %v205_v32, %v170_v46 }
 0x123   :  { %182 = vst [vmem:[#allocation7 + $0x18] sm:$0xff] %v156_v43  ;;  %186 = vst [vmem:[#allocation7 + $0x38] sm:$0xff] %v176_v44 }
 0x124   :  { %181 = vst [vmem:[#allocation7 + $0x10] sm:$0xff] %v151_v47  ;;  %185 = vst [vmem:[#allocation7 + $0x30] sm:$0xff] %v171_v48 }
 0x125   :  { %382 = shalt.err (!%p379_p6)
}
 0x126   :  { %s383_s15 = scalar_lea.hbm %s475_s3, 1024 }
 0x127   :  { %p384_p7 = scmp.ne.s32.totalorder %s475_s3, %s383_s15  ;;  %p387_p8 = scmp.lt.u32.totalorder %s383_s15, %s475_s3 }
 0x129   :  { %p389_p9 = pnand %p387_p8, %p384_p7 }
 0x12b   :  { %392 = shalt.err (!%p389_p9)
}
 0x12c   :  { %198 = dma.vmem_to_hbm [thread:$0]  %s193_s12, 1024, %s475_s3, [#allocation4], %s400_s22, %s400_s22, %s401_s23  }
 0x12d   :  { %397 = dma.done.wait [#allocation4], 1024  }
 0x12e   :  { %398 = vsyncadd [#allocation4], 4294966272 }
 0x12f   :  { %202 = vsyncpa [#allocation3], 1 }
 0x130   :  { %203 = vsyncpa [#allocation6], 1 }
 0x131   :  { %204 = vsyncpa [#allocation4], 1 }

</bundles_post_ra>
